<compile_context>
chip_gen: v7x
topology: tpu7x:2x2x1
jax: 0.10.0
libtpu: 0.0.40
codegen_flags: <defaults>
</compile_context>

<pallas_src>
import functools

import jax
import jax.numpy as jnp
import numpy as np
from jax.experimental import pallas as pl
from jax.experimental.pallas import tpu as pltpu


def _knn_kernel(xc_ref, xq_ref, idx_ref, neg_ref, *, n_real, precision):
    """Per (batch, query-tile) KNN over a transposed, lane-dense score matrix.

    xc_ref:  (1, N_pad_c, C_aug)  candidates [x_j, ||x_j||^2, 0-pad]
    xq_ref:  (1, TILE_M, C_aug)   queries    [2*x_q,      -1, 0-pad]
    idx_ref: (1, K, TILE_M)       int32 out: idx_ref[0, j, q] = j-th NN of q
    neg_ref: (N_pad_c, TILE_M)    f32 scratch: score[j, q] = 2 x_q.x_j - ||x_j||^2,
                                  progressively masked as neighbors are taken.
    """
    xc = xc_ref[0]
    xq = xq_ref[0]
    n_pad_c = xc.shape[0]
    tile_m = xq.shape[0]
    k_total = idx_ref.shape[1]

    # One augmented MXU matmul produces every pairwise score (the per-query
    # ||x_q||^2 constant is dropped -- it does not change per-query ordering).
    neg = jax.lax.dot_general(
        xc, xq, (((1,), (1,)), ((), ())),
        preferred_element_type=jnp.float32,
        precision=precision)                               # (N_pad_c, TILE_M)

    if n_real < n_pad_c:
        row_ids = jax.lax.broadcasted_iota(jnp.int32, (n_pad_c, tile_m), 0)
        neg = jnp.where(row_ids >= n_real, -jnp.inf, neg)  # never pick padding

    # VALU-bound selection loop.  k_total is static -> fully unrolled Python
    # loop; the big buffer lives in neg_ref so live ranges stay bounded.
    rows = []
    sel_prev = None
    for j in range(k_total):
        if j == 0:
            cur = neg                       # peeled: no mask pass needed
            if k_total > 1:
                neg_ref[...] = cur          # seed scratch for iteration 1
        else:
            ids = jax.lax.broadcasted_iota(jnp.int32, (n_pad_c, tile_m), 0)
            cur = jnp.where(ids == sel_prev, -jnp.inf, neg_ref[...])
            if j < k_total - 1:
                neg_ref[...] = cur          # final write-back is dead -> skip
        mx = jnp.max(cur, axis=0, keepdims=True)           # (1, TILE_M)
        ids = jax.lax.broadcasted_iota(jnp.int32, (n_pad_c, tile_m), 0)
        cand = jnp.where(cur >= mx, ids, n_pad_c)
        sel = jnp.min(cand, axis=0, keepdims=True)         # (1, TILE_M) int32
        rows.append(sel)
        sel_prev = sel

    # batched, dense store of all selected rows (no per-step sublane stores)
    idx_ref[0] = jnp.concatenate(rows, axis=0)


def _round_up(x, m):
    return ((x + m - 1) // m) * m


def _vmem_plan():
    """(scratch_budget_bytes, vmem_limit_bytes) per TPU generation.

    The declared (N_pad_c, TILE_M) f32 scratch is only ~1/4 of the peak VMEM
    need: up to ~3 same-size temporaries (masked scores, index iota, tie-break
    candidates) are live inside one selection step, so the scratch budget is
    sized at roughly (vmem_limit - headroom) / 4.
    """
    cap = None
    try:
        cap = getattr(pltpu.get_tpu_info(), "vmem_capacity_bytes", None)
    except Exception:
        cap = None
    if cap is None or cap <= (64 << 20):
        # v7x-class (64 MiB per TensorCore) or unknown: stay clear of spills.
        return 7 << 20, 48 << 20
    # v5e / v6e: 128 MiB physical -- bigger tiles amortize per-grid-step
    # overhead and the per-tile matmul setup.
    return 22 << 20, 100 << 20


def _choose_tile_m(n_pad_c, n_query, budget_bytes, prefer=1024):
    """Largest multiple-of-128 query tile (<= prefer) whose f32 score scratch
    fits the budget.  Decoupled from divisors of the point count: the query
    axis is padded up to a multiple of the chosen tile instead."""
    max_rows = budget_bytes // (n_pad_c * 4)
    t = min(prefer, max_rows)
    t = max(128, (t // 128) * 128)
    return min(t, _round_up(n_query, 128))


def dense_dilated_knn_graph(x, k=9, dilation=1):
    """JAX/Pallas equivalent of DenseDilatedKnnGraph.forward.

    x: (B, C, N, 1)  ->  edge_index: (2, B, N, k) int32
    """
    B, C, N, _ = x.shape
    k_total = k * dilation
    assert k_total <= N, f"k*dilation={k_total} must be <= num_points={N}"

    # glue: NCHW(H=N, W=1) -> (B, N, C), same as x.transpose(2, 1).squeeze(-1)
    xt = jnp.transpose(x[..., 0], (0, 2, 1)).astype(jnp.float32)

    # Augmentation hoisted out of the kernel (was O(N*C) VPU work + two
    # lane-sparse concats repeated per grid step):
    #   score[j, q] = cand_aug[j] . query_aug[q] = 2 x_q.x_j - ||x_j||^2
    c_aug = max(8, _round_up(C + 1, 8))      # lane-friendly contraction width
    xsq = jnp.sum(xt * xt, axis=-1, keepdims=True)
    fpad = jnp.zeros((B, N, c_aug - (C + 1)), jnp.float32)
    cand_aug = jnp.concatenate([xt, xsq, fpad], axis=-1)
    query_aug = jnp.concatenate(
        [2.0 * xt, jnp.full((B, N, 1), -1.0, jnp.float32), fpad], axis=-1)

    scratch_budget, vmem_limit = _vmem_plan()

    n_pad_c = _round_up(N, 8)                           # candidate (sublane) axis
    tile_m = _choose_tile_m(n_pad_c, N, scratch_budget)
    # v7x megacore: with B == 1 make sure both TensorCores get grid steps.
    if B == 1:
        while _round_up(N, tile_m) // tile_m < 2 and tile_m > 128:
            tile_m = max(128, ((tile_m // 2) // 128) * 128)
    n_pad_q = _round_up(N, tile_m)                      # query (lane) axis
    num_tiles = n_pad_q // tile_m

    if n_pad_c != N:
        cand_aug = jnp.pad(cand_aug, ((0, 0), (0, n_pad_c - N), (0, 0)))
    if n_pad_q != N:
        query_aug = jnp.pad(query_aug, ((0, 0), (0, n_pad_q - N), (0, 0)))

    # HIGHEST only costs extra MXU passes; with a tiny contraction the MXU is
    # idle anyway, so keep full f32 fidelity there.  Wide (feature-space) KNN
    # drops to DEFAULT -- the extra passes would be pure waste.
    precision = (jax.lax.Precision.HIGHEST if c_aug <= 16
                 else jax.lax.Precision.DEFAULT)

    kernel = functools.partial(_knn_kernel, n_real=N, precision=precision)

    # Kernel output is transposed + lane dense: (B, k_total, N_pad_q).
    # NOTE: the candidate block is constant across the inner grid axis; on a
    # VMEM-starved config it could be dropped to pl.Buffered(1), but with the
    # conservative budgets above double-buffering fits comfortably.
    nn_idx_t = pl.pallas_call(
        kernel,
        out_shape=jax.ShapeDtypeStruct((B, k_total, n_pad_q), jnp.int32),
        grid_spec=pltpu.PrefetchScalarGridSpec(
            num_scalar_prefetch=0,
            grid=(B, num_tiles),
            in_specs=[
                pl.BlockSpec((1, n_pad_c, c_aug), lambda b, m: (b, 0, 0)),
                pl.BlockSpec((1, tile_m, c_aug), lambda b, m: (b, m, 0)),
            ],
            out_specs=pl.BlockSpec((1, k_total, tile_m), lambda b, m: (b, 0, m)),
            scratch_shapes=[pltpu.VMEM((n_pad_c, tile_m), jnp.float32)],
        ),
        compiler_params=pltpu.CompilerParams(
            dimension_semantics=("parallel", "parallel"),
            vmem_limit_bytes=vmem_limit),
    )(cand_aug, query_aug)

    # layout plumbing back to the PyTorch convention: (B, N, k_total)
    nn_idx = jnp.transpose(nn_idx_t, (0, 2, 1))[:, :N, :]

    center_idx = jnp.broadcast_to(
        jnp.arange(N, dtype=jnp.int32)[None, :, None], (B, N, k_total))

    edge_index = jnp.stack([nn_idx, center_idx], axis=0)      # (2, B, N, k*d)

    # DenseDilated, deterministic branch: every `dilation`-th neighbor.
    # TODO(synk): stochastic=True branch (runtime torch.randperm) not implemented.
    return edge_index[:, :, :, ::dilation]                    # (2, B, N, k)


if __name__ == "__main__":
    B, C, N = 2, 4, 16
    k, dilation = 3, 2

    x = jax.random.normal(jax.random.PRNGKey(0), (B, C, N, 1), dtype=jnp.float32)

    edge_index = jax.block_until_ready(
        dense_dilated_knn_graph(x, k=k, dilation=dilation))
    assert edge_index.shape == (2, B, N, k), edge_index.shape

    # --- pure-JAX reference (mirrors the PyTorch code) -----------------------
    xt = jnp.transpose(x[..., 0], (0, 2, 1))                  # (B, N, C)
    inner = -2.0 * jnp.einsum("bnc,bmc->bnm", xt, xt,
                              precision=jax.lax.Precision.HIGHEST)
    sq = jnp.sum(xt * xt, axis=-1, keepdims=True)
    dist = sq + inner + jnp.swapaxes(sq, 1, 2)                # (B, N, N)
    ref_vals, ref_idx = jax.lax.top_k(-dist, k * dilation)

    # Compare the distances of the selected neighbors (robust to exact-tie
    # ordering) and the center indices exactly.
    got_d = jnp.take_along_axis(dist, edge_index[0], axis=-1)
    want_d = (-ref_vals)[:, :, ::dilation]
    np.testing.assert_allclose(np.asarray(got_d), np.asarray(want_d),
                               rtol=1e-4, atol=1e-4)

    ref_center = jnp.broadcast_to(
        jnp.arange(N, dtype=jnp.int32)[None, :, None],
        (B, N, k * dilation))[:, :, ::dilation]
    np.testing.assert_array_equal(np.asarray(edge_index[1]),
                                  np.asarray(ref_center))

    # every returned index must point at a real (non-padded) point
    assert int(jnp.max(edge_index[0])) < N

    print("KERNEL_OK")
</pallas_src>

<mosaic_0001>
module attributes {stable_mosaic.version = 11 : i64} {
  func.func @_knn_kernel(%arg0: i32, %arg1: i32, %arg2: memref<1x16x8xf32, #tpu.memory_space<vmem>>, %arg3: memref<1x128x8xf32, #tpu.memory_space<vmem>>, %arg4: memref<1x6x128xi32, #tpu.memory_space<vmem>>, %arg5: memref<16x128xf32, #tpu.memory_space<vmem>>) attributes {dimension_semantics = [#tpu.dimension_semantics<parallel>, #tpu.dimension_semantics<parallel>], iteration_bounds = array<i64: 2, 1>, scalar_prefetch = 0 : i64, scratch_operands = 1 : i64, tpu.core_type = #tpu.core_type<tc>, window_params = [{transform_indices = @transform_0, window_bounds = array<i64: 1, 16, 8>}, {transform_indices = @transform_1, window_bounds = array<i64: 1, 128, 8>}, {transform_indices = @transform_2, window_bounds = array<i64: 1, 6, 128>}]} {
    %c0 = arith.constant 0 : index
    %c0_0 = arith.constant 0 : index
    %c0_1 = arith.constant 0 : index
    %0 = vector.load %arg2[%c0, %c0_0, %c0_1] : memref<1x16x8xf32, #tpu.memory_space<vmem>>, vector<1x16x8xf32>
    %1 = vector.shape_cast %0 : vector<1x16x8xf32> to vector<16x8xf32>
    %c0_2 = arith.constant 0 : index
    %c0_3 = arith.constant 0 : index
    %c0_4 = arith.constant 0 : index
    %2 = vector.load %arg3[%c0_2, %c0_3, %c0_4] : memref<1x128x8xf32, #tpu.memory_space<vmem>>, vector<1x128x8xf32>
    %3 = vector.shape_cast %2 : vector<1x128x8xf32> to vector<128x8xf32>
    %cst = arith.constant dense<0.000000e+00> : vector<16x128xf32>
    %4 = tpu.matmul %1, %3, %cst {dimension_numbers = #tpu.dot_dimension_numbers<[1], [1], [0], [0], [0, 0, 1, 0], [], []>, precision = #tpu.contract_precision<fp32>} : vector<16x8xf32>, vector<128x8xf32>, vector<16x128xf32> -> vector<16x128xf32>
    %c0_5 = arith.constant 0 : index
    %c0_6 = arith.constant 0 : index
    %5 = vector.load %arg5[%c0_5, %c0_6] : memref<16x128xf32, #tpu.memory_space<vmem>>, vector<16x128xf32>
    tpu.vector_store %arg5[%c0_5, %c0_6], %4 {strides = array<i32>} : memref<16x128xf32, #tpu.memory_space<vmem>>, vector<16x128xf32>,
    %cst_7 = arith.constant dense<0xFF800000> : vector<128xf32>
    %6 = vector.multi_reduction <maximumf>, %4, %cst_7 [0] : vector<16x128xf32> to vector<128xf32>
    %7 = vector.shape_cast %6 : vector<128xf32> to vector<1x128xf32>
    %8 = tpu.iota {dimensions = array<i32: 0>} : vector<16x128xi32>
    %9 = vector.broadcast %7 : vector<1x128xf32> to vector<16x128xf32>
    %10 = arith.cmpf oge, %4, %9 : vector<16x128xf32>
    %c16_i32 = arith.constant 16 : i32
    %11 = vector.broadcast %c16_i32 : i32 to vector<16x128xi32>
    %12 = arith.select %10, %8, %11 : vector<16x128xi1>, vector<16x128xi32>
    %cst_8 = arith.constant dense<2147483647> : vector<128xi32>
    %13 = vector.multi_reduction <minsi>, %12, %cst_8 [0] : vector<16x128xi32> to vector<128xi32>
    %14 = vector.shape_cast %13 : vector<128xi32> to vector<1x128xi32>
    %15 = tpu.iota {dimensions = array<i32: 0>} : vector<16x128xi32>
    %16 = vector.broadcast %14 : vector<1x128xi32> to vector<16x128xi32>
    %17 = arith.cmpi eq, %15, %16 : vector<16x128xi32>
    %c0_9 = arith.constant 0 : index
    %c0_10 = arith.constant 0 : index
    %18 = vector.load %arg5[%c0_9, %c0_10] : memref<16x128xf32, #tpu.memory_space<vmem>>, vector<16x128xf32>
    %cst_11 = arith.constant 0xFF800000 : f32
    %19 = vector.broadcast %cst_11 : f32 to vector<16x128xf32>
    %20 = arith.select %17, %19, %18 : vector<16x128xi1>, vector<16x128xf32>
    %c0_12 = arith.constant 0 : index
    %c0_13 = arith.constant 0 : index
    %21 = vector.load %arg5[%c0_12, %c0_13] : memref<16x128xf32, #tpu.memory_space<vmem>>, vector<16x128xf32>
    tpu.vector_store %arg5[%c0_12, %c0_13], %20 {strides = array<i32>} : memref<16x128xf32, #tpu.memory_space<vmem>>, vector<16x128xf32>,
    %cst_14 = arith.constant dense<0xFF800000> : vector<128xf32>
    %22 = vector.multi_reduction <maximumf>, %20, %cst_14 [0] : vector<16x128xf32> to vector<128xf32>
    %23 = vector.shape_cast %22 : vector<128xf32> to vector<1x128xf32>
    %24 = tpu.iota {dimensions = array<i32: 0>} : vector<16x128xi32>
    %25 = vector.broadcast %23 : vector<1x128xf32> to vector<16x128xf32>
    %26 = arith.cmpf oge, %20, %25 : vector<16x128xf32>
    %c16_i32_15 = arith.constant 16 : i32
    %27 = vector.broadcast %c16_i32_15 : i32 to vector<16x128xi32>
    %28 = arith.select %26, %24, %27 : vector<16x128xi1>, vector<16x128xi32>
    %cst_16 = arith.constant dense<2147483647> : vector<128xi32>
    %29 = vector.multi_reduction <minsi>, %28, %cst_16 [0] : vector<16x128xi32> to vector<128xi32>
    %30 = vector.shape_cast %29 : vector<128xi32> to vector<1x128xi32>
    %31 = tpu.iota {dimensions = array<i32: 0>} : vector<16x128xi32>
    %32 = vector.broadcast %30 : vector<1x128xi32> to vector<16x128xi32>
    %33 = arith.cmpi eq, %31, %32 : vector<16x128xi32>
    %c0_17 = arith.constant 0 : index
    %c0_18 = arith.constant 0 : index
    %34 = vector.load %arg5[%c0_17, %c0_18] : memref<16x128xf32, #tpu.memory_space<vmem>>, vector<16x128xf32>
    %cst_19 = arith.constant 0xFF800000 : f32
    %35 = vector.broadcast %cst_19 : f32 to vector<16x128xf32>
    %36 = arith.select %33, %35, %34 : vector<16x128xi1>, vector<16x128xf32>
    %c0_20 = arith.constant 0 : index
    %c0_21 = arith.constant 0 : index
    %37 = vector.load %arg5[%c0_20, %c0_21] : memref<16x128xf32, #tpu.memory_space<vmem>>, vector<16x128xf32>
    tpu.vector_store %arg5[%c0_20, %c0_21], %36 {strides = array<i32>} : memref<16x128xf32, #tpu.memory_space<vmem>>, vector<16x128xf32>,
    %cst_22 = arith.constant dense<0xFF800000> : vector<128xf32>
    %38 = vector.multi_reduction <maximumf>, %36, %cst_22 [0] : vector<16x128xf32> to vector<128xf32>
    %39 = vector.shape_cast %38 : vector<128xf32> to vector<1x128xf32>
    %40 = tpu.iota {dimensions = array<i32: 0>} : vector<16x128xi32>
    %41 = vector.broadcast %39 : vector<1x128xf32> to vector<16x128xf32>
    %42 = arith.cmpf oge, %36, %41 : vector<16x128xf32>
    %c16_i32_23 = arith.constant 16 : i32
    %43 = vector.broadcast %c16_i32_23 : i32 to vector<16x128xi32>
    %44 = arith.select %42, %40, %43 : vector<16x128xi1>, vector<16x128xi32>
    %cst_24 = arith.constant dense<2147483647> : vector<128xi32>
    %45 = vector.multi_reduction <minsi>, %44, %cst_24 [0] : vector<16x128xi32> to vector<128xi32>
    %46 = vector.shape_cast %45 : vector<128xi32> to vector<1x128xi32>
    %47 = tpu.iota {dimensions = array<i32: 0>} : vector<16x128xi32>
    %48 = vector.broadcast %46 : vector<1x128xi32> to vector<16x128xi32>
    %49 = arith.cmpi eq, %47, %48 : vector<16x128xi32>
    %c0_25 = arith.constant 0 : index
    %c0_26 = arith.constant 0 : index
    %50 = vector.load %arg5[%c0_25, %c0_26] : memref<16x128xf32, #tpu.memory_space<vmem>>, vector<16x128xf32>
    %cst_27 = arith.constant 0xFF800000 : f32
    %51 = vector.broadcast %cst_27 : f32 to vector<16x128xf32>
    %52 = arith.select %49, %51, %50 : vector<16x128xi1>, vector<16x128xf32>
    %c0_28 = arith.constant 0 : index
    %c0_29 = arith.constant 0 : index
    %53 = vector.load %arg5[%c0_28, %c0_29] : memref<16x128xf32, #tpu.memory_space<vmem>>, vector<16x128xf32>
    tpu.vector_store %arg5[%c0_28, %c0_29], %52 {strides = array<i32>} : memref<16x128xf32, #tpu.memory_space<vmem>>, vector<16x128xf32>,
    %cst_30 = arith.constant dense<0xFF800000> : vector<128xf32>
    %54 = vector.multi_reduction <maximumf>, %52, %cst_30 [0] : vector<16x128xf32> to vector<128xf32>
    %55 = vector.shape_cast %54 : vector<128xf32> to vector<1x128xf32>
    %56 = tpu.iota {dimensions = array<i32: 0>} : vector<16x128xi32>
    %57 = vector.broadcast %55 : vector<1x128xf32> to vector<16x128xf32>
    %58 = arith.cmpf oge, %52, %57 : vector<16x128xf32>
    %c16_i32_31 = arith.constant 16 : i32
    %59 = vector.broadcast %c16_i32_31 : i32 to vector<16x128xi32>
    %60 = arith.select %58, %56, %59 : vector<16x128xi1>, vector<16x128xi32>
    %cst_32 = arith.constant dense<2147483647> : vector<128xi32>
    %61 = vector.multi_reduction <minsi>, %60, %cst_32 [0] : vector<16x128xi32> to vector<128xi32>
    %62 = vector.shape_cast %61 : vector<128xi32> to vector<1x128xi32>
    %63 = tpu.iota {dimensions = array<i32: 0>} : vector<16x128xi32>
    %64 = vector.broadcast %62 : vector<1x128xi32> to vector<16x128xi32>
    %65 = arith.cmpi eq, %63, %64 : vector<16x128xi32>
    %c0_33 = arith.constant 0 : index
    %c0_34 = arith.constant 0 : index
    %66 = vector.load %arg5[%c0_33, %c0_34] : memref<16x128xf32, #tpu.memory_space<vmem>>, vector<16x128xf32>
    %cst_35 = arith.constant 0xFF800000 : f32
    %67 = vector.broadcast %cst_35 : f32 to vector<16x128xf32>
    %68 = arith.select %65, %67, %66 : vector<16x128xi1>, vector<16x128xf32>
    %c0_36 = arith.constant 0 : index
    %c0_37 = arith.constant 0 : index
    %69 = vector.load %arg5[%c0_36, %c0_37] : memref<16x128xf32, #tpu.memory_space<vmem>>, vector<16x128xf32>
    tpu.vector_store %arg5[%c0_36, %c0_37], %68 {strides = array<i32>} : memref<16x128xf32, #tpu.memory_space<vmem>>, vector<16x128xf32>,
    %cst_38 = arith.constant dense<0xFF800000> : vector<128xf32>
    %70 = vector.multi_reduction <maximumf>, %68, %cst_38 [0] : vector<16x128xf32> to vector<128xf32>
    %71 = vector.shape_cast %70 : vector<128xf32> to vector<1x128xf32>
    %72 = tpu.iota {dimensions = array<i32: 0>} : vector<16x128xi32>
    %73 = vector.broadcast %71 : vector<1x128xf32> to vector<16x128xf32>
    %74 = arith.cmpf oge, %68, %73 : vector<16x128xf32>
    %c16_i32_39 = arith.constant 16 : i32
    %75 = vector.broadcast %c16_i32_39 : i32 to vector<16x128xi32>
    %76 = arith.select %74, %72, %75 : vector<16x128xi1>, vector<16x128xi32>
    %cst_40 = arith.constant dense<2147483647> : vector<128xi32>
    %77 = vector.multi_reduction <minsi>, %76, %cst_40 [0] : vector<16x128xi32> to vector<128xi32>
    %78 = vector.shape_cast %77 : vector<128xi32> to vector<1x128xi32>
    %79 = tpu.iota {dimensions = array<i32: 0>} : vector<16x128xi32>
    %80 = vector.broadcast %78 : vector<1x128xi32> to vector<16x128xi32>
    %81 = arith.cmpi eq, %79, %80 : vector<16x128xi32>
    %c0_41 = arith.constant 0 : index
    %c0_42 = arith.constant 0 : index
    %82 = vector.load %arg5[%c0_41, %c0_42] : memref<16x128xf32, #tpu.memory_space<vmem>>, vector<16x128xf32>
    %cst_43 = arith.constant 0xFF800000 : f32
    %83 = vector.broadcast %cst_43 : f32 to vector<16x128xf32>
    %84 = arith.select %81, %83, %82 : vector<16x128xi1>, vector<16x128xf32>
    %cst_44 = arith.constant dense<0xFF800000> : vector<128xf32>
    %85 = vector.multi_reduction <maximumf>, %84, %cst_44 [0] : vector<16x128xf32> to vector<128xf32>
    %86 = vector.shape_cast %85 : vector<128xf32> to vector<1x128xf32>
    %87 = tpu.iota {dimensions = array<i32: 0>} : vector<16x128xi32>
    %88 = vector.broadcast %86 : vector<1x128xf32> to vector<16x128xf32>
    %89 = arith.cmpf oge, %84, %88 : vector<16x128xf32>
    %c16_i32_45 = arith.constant 16 : i32
    %90 = vector.broadcast %c16_i32_45 : i32 to vector<16x128xi32>
    %91 = arith.select %89, %87, %90 : vector<16x128xi1>, vector<16x128xi32>
    %cst_46 = arith.constant dense<2147483647> : vector<128xi32>
    %92 = vector.multi_reduction <minsi>, %91, %cst_46 [0] : vector<16x128xi32> to vector<128xi32>
    %93 = vector.shape_cast %92 : vector<128xi32> to vector<1x128xi32>
    %94 = tpu.concatenate %14, %30, %46, %62, %78, %93 in 0 : vector<1x128xi32>, vector<1x128xi32>, vector<1x128xi32>, vector<1x128xi32>, vector<1x128xi32>, vector<1x128xi32> -> vector<6x128xi32>
    %c0_47 = arith.constant 0 : index
    %c0_48 = arith.constant 0 : index
    %c0_49 = arith.constant 0 : index
    %95 = vector.load %arg4[%c0_47, %c0_48, %c0_49] : memref<1x6x128xi32, #tpu.memory_space<vmem>>, vector<1x6x128xi32>
    %96 = vector.shape_cast %95 : vector<1x6x128xi32> to vector<6x128xi32>
    %97 = vector.shape_cast %94 : vector<6x128xi32> to vector<1x6x128xi32>
    tpu.vector_store %arg4[%c0_47, %c0_48, %c0_49], %97 {strides = array<i32>} : memref<1x6x128xi32, #tpu.memory_space<vmem>>, vector<1x6x128xi32>,
    return
  }
  func.func @transform_0(%arg0: i32, %arg1: i32) -> (i32, i32, i32) {
    %c0_i32 = arith.constant 0 : i32
    %c0_i32_0 = arith.constant 0 : i32
    %c0_i32_1 = arith.constant 0 : i32
    return %arg0, %c0_i32, %c0_i32_0 : i32, i32, i32
  }
  func.func @transform_1(%arg0: i32, %arg1: i32) -> (i32, i32, i32) {
    %c0_i32 = arith.constant 0 : i32
    %c0_i32_0 = arith.constant 0 : i32
    return %arg0, %arg1, %c0_i32 : i32, i32, i32
  }
  func.func @transform_2(%arg0: i32, %arg1: i32) -> (i32, i32, i32) {
    %c0_i32 = arith.constant 0 : i32
    %c0_i32_0 = arith.constant 0 : i32
    return %arg0, %c0_i32, %arg1 : i32, i32, i32
  }
}

</mosaic_0001>

<bundles_post_ra>
// kernel: tpu_custom_call.1
= control target key start
LH: loop header
LB: loop body
LE: loop exit
PB: predicated region body
PF: predicated region fallthrough
CT: control target
= control target key end

     0   :  { %s1827_s9 = smov 0   ;;  %s1829_s10 = smov 0   ;;  %s2133_s0 = inlined_call_operand.vmem [shape: f32[2,16,8], index: 0, kind: input, shape index: {}]   ;;  %s2134_s1 = inlined_call_operand.vmem [shape: f32[2,128,8], index: 1, kind: input, shape index: {}]   ;;  %s2135_s2 = inlined_call_operand.vmem [shape: s32[2,6,128], index: 2, kind: output, shape index: {}]  }
   0x1   :  { %s1831_s11 = smov 0  }
   0x2 LB: > { %s24_s12 = sadd.s32 1, %s1806_s10  ;;  %p1234_p0 = scmp.ge.s32.totalorder %s1810_s11, 1  ;;  %s1810_s11 = sphi %s1831_s11, %s12_s11   ;;  %s1806_s10 = sphi %s1829_s10, %s2137_s10   ;;  %s1802_s9 = sphi %s1827_s9, %s2136_s9  }
   0x3   : > { %p26_p1 = scmp.ge.s32.totalorder %s24_s12, 2  ;;  %p143_p2 = scmp.lt.s32.totalorder %s1810_s11, 3 }
   0x5   : > { %s2139_s12 = smov (%p26_p1, %s24_s12), 0  ;;  %p144_p3 = pnand %p1234_p0, %p143_p2 }
   0x6   : > { %p176_p4 = scmp.lt.s32.totalorder (!%p144_p3), %s1802_s9, 1  ;;  %vm216_vm0 = vcmask (!%p144_p3), 64512   ;;  %vm1130_vm14 = vcmask (!%p144_p3), 1040384  }
   0x7   : > { %147 = sbr.rel (%p144_p3) target bundleno = 622 (0x26e), region = 28 }
   0xe   : > { %s2141_s9 = smov (!%p176_p4, %s1802_s9), 1 }
   0xf   : > { %s1243_s13 = sshll.u32 %s2141_s9, 7  ;;  %s1242_s17 = sshll.u32 %s2141_s9, 4 }
  0x10   : > { %s1851_s16 = scalar_lea.vmem %s2134_s1, %s1243_s13  ;;  %s1869_s20 = scalar_lea.vmem %s2133_s0, %s1242_s17 }
  0x11   : > { %v200_v0 = vld [vmem:[%s1851_s16] sm:$0xff]  ;;  %v201_v1 = vld [vmem:[%s1851_s16 + $0x8] sm:$0xff]  ;;  %v202_v2 = vld [vmem:[%s1851_s16 + $0x10] sm:$0xff]  ;;  %s1239_s21 = sshll.u32 %s2141_s9, 3 }
  0x12   : > { %v224_v3 = vsel %vm216_vm0, %v200_v0, 0  ;;  %v227_v4 = vsel %vm216_vm0, %v201_v1, 0  ;;  %v203_v5 = vld [vmem:[%s1851_s16 + $0x18] sm:$0xff]  ;;  %v230_v6 = vsel %vm216_vm0, %v202_v2, 0  ;;  %v204_v11 = vld [vmem:[%s1851_s16 + $0x20] sm:$0xff]  ;;  %v205_v12 = vld [vmem:[%s1851_s16 + $0x28] sm:$0xff]  ;;  %s197_s24 = scalar_lea.vmem %s2135_s2, %s1239_s21 }
  0x13   : > { %v272_v7 = vand.u32 4294901760, %v224_v3  ;;  %v275_v8 = vand.u32 4294901760, %v227_v4  ;;  %v233_v9 = vsel %vm216_vm0, %v203_v5, 0  ;;  %v278_v10 = vand.u32 4294901760, %v230_v6  ;;  %v198_v18 = vld [vmem:[%s1869_s20] sm:$0xff]  ;;  %v206_v21 = vld [vmem:[%s1851_s16 + $0x30] sm:$0xff] }
  0x14   : > { %v281_v13 = vand.u32 4294901760, %v233_v9  ;;  %v236_v16 = vsel %vm216_vm0, %v204_v11, 0  ;;  %v239_v17 = vsel %vm216_vm0, %v205_v12, 0  ;;  %v207_v22 = vld [vmem:[%s1851_s16 + $0x38] sm:$0xff]  ;;  %v218_v23 = vsel %vm216_vm0, %v198_v18, 0  ;;  %v208_v32 = vld [vmem:[%s1851_s16 + $0x40] sm:$0xff] }
  0x15   : > { %v1864_v14 = vpack.c.bf16 %v275_v8, %v272_v7  ;;  %v284_v19 = vand.u32 4294901760, %v236_v16  ;;  %v287_v20 = vand.u32 4294901760, %v239_v17  ;;  %v1885_v24 = vand.u32 4294901760, %v218_v23  ;;  %v209_v33 = vld [vmem:[%s1851_s16 + $0x48] sm:$0xff]  ;;  %v210_v41 = vld [vmem:[%s1851_s16 + $0x50] sm:$0xff]  ;;  %v211_v42 = vld [vmem:[%s1851_s16 + $0x58] sm:$0xff] }
  0x16   : > { %v1871_v15 = vpack.c.bf16 %v281_v13, %v278_v10  ;;  %v242_v26 = vsel %vm216_vm0, %v206_v21, 0  ;;  %v245_v27 = vsel %vm216_vm0, %v207_v22, 0  ;;  %v248_v37 = vsel %vm216_vm0, %v208_v32, 0  ;;  %v212_v61 = vld [vmem:[%s1851_s16 + $0x60] sm:$0xff]  ;;  %v213_v62 = vld [vmem:[%s1851_s16 + $0x68] sm:$0xff] }
  0x17   : > { %1563 = vmatprep.subr.bf16.mxu1 %v1864_v14  ;;  %1659 = vmatprep.subr.bf16.mxu0 %v1864_v14  ;;  %v1887_v25 = vpack.c.bf16 %v287_v20, %v284_v19  ;;  %v1892_v28 = vsub.f32 %v218_v23, %v1885_v24  ;;  %v290_v30 = vand.u32 4294901760, %v242_v26  ;;  %v293_v31 = vand.u32 4294901760, %v245_v27  ;;  %v199_v12 = vld [vmem:[%s1869_s20 + $0x8] sm:$0xff] }
  0x18   : > { %1565 = vmatpush3.bf16.xpose.msra.mxu1 %v1864_v14  ;;  %1661 = vmatpush3.bf16.xpose.msra.mxu0 %v1864_v14  ;;  %v251_v38 = vsel %vm216_vm0, %v209_v33, 0  ;;  %v296_v39 = vand.u32 4294901760, %v248_v37  ;;  %v254_v44 = vsel %vm216_vm0, %v210_v41, 0  ;;  %v1915_v45 = vsub.f32 %v224_v3, %v272_v7 }
  0x19   : > { %1567 = vmatprep.subr.bf16.mxu1 %v1871_v15  ;;  %1663 = vmatprep.subr.bf16.mxu0 %v1871_v15  ;;  %v354_v29 = vand.u32 4294901760, %v1892_v28  ;;  %v1902_v36 = vpack.c.bf16 %v293_v31, %v290_v30  ;;  %v299_v40 = vand.u32 4294901760, %v251_v38  ;;  %v1917_v46 = vsub.f32 %v227_v4, %v275_v8 }
  0x1a   : > { %v1919_v47 = vsub.f32 %v230_v6, %v278_v10  ;;  %v1921_v48 = vsub.f32 %v233_v9, %v281_v13  ;;  %v257_v49 = vsel %vm216_vm0, %v211_v42, 0  ;;  %v1924_v50 = vsub.f32 %v236_v16, %v284_v19  ;;  %v214_v9 = vld [vmem:[%s1851_s16 + $0x70] sm:$0xff]  ;;  %v215_v10 = vld [vmem:[%s1851_s16 + $0x78] sm:$0xff] }
  0x1b   : > { %v355_v34 = vsub.f32 %v1892_v28, %v354_v29  ;;  %1489 = vmatprep.mubr.f32.mxu0 %v354_v29  ;;  %v1912_v43 = vpack.c.bf16 %v299_v40, %v296_v39  ;;  %v1926_v51 = vsub.f32 %v239_v17, %v287_v20  ;;  %v1930_v52 = vpack.c.bf16 %v1917_v46, %v1915_v45 }
  0x1c   : > { %v1934_v53 = vpack.c.bf16 %v1921_v48, %v1919_v47  ;;  %v302_v54 = vand.u32 4294901760, %v254_v44  ;;  %v1938_v55 = vsub.f32 %v242_v26, %v290_v30  ;;  %v1940_v56 = vsub.f32 %v245_v27, %v293_v31 }
  0x1d   : > { %v356_v35 = vand.u32 4294901760, %v355_v34  ;;  %v305_v57 = vand.u32 4294901760, %v257_v49  ;;  %v1944_v58 = vsub.f32 %v248_v37, %v296_v39  ;;  %v1946_v59 = vsub.f32 %v251_v38, %v299_v40 }
  0x1e   : > { %v1950_v60 = vpack.c.bf16 %v1926_v51, %v1924_v50  ;;  %v1956_v63 = vpack.c.bf16 %v1940_v56, %v1938_v55  ;;  %v260_v2 = vsel %vm216_vm0, %v212_v61, 0  ;;  %v263_v3 = vsel %vm216_vm0, %v213_v62, 0 }
  0x1f   : > { %1384 = vmatprep.mubr.f32.mxu1 %v356_v35  ;;  %v1960_v0 = vpack.c.bf16 %v1946_v59, %v1944_v58  ;;  %v1962_v1 = vpack.c.bf16 %v305_v57, %v302_v54  ;;  %v1966_v4 = vsub.f32 %v254_v44, %v302_v54  ;;  %v1968_v5 = vsub.f32 %v257_v49, %v305_v57 }
  0x20   : > { %1569 = vmatpush3.bf16.xpose.msra.mxu1 %v1871_v15  ;;  %1665 = vmatpush3.bf16.xpose.msra.mxu0 %v1871_v15  ;;  %v308_v7 = vand.u32 4294901760, %v260_v2  ;;  %v311_v8 = vand.u32 4294901760, %v263_v3  ;;  %v266_v13 = vsel %vm216_vm0, %v214_v9, 0  ;;  %v269_v16 = vsel %vm216_vm0, %v215_v10, 0 }
  0x21   : > { %1571 = vmatprep.subr.bf16.mxu1 %v1887_v25  ;;  %1667 = vmatprep.subr.bf16.mxu0 %v1887_v25  ;;  %v1974_v6 = vpack.c.bf16 %v1968_v5, %v1966_v4  ;;  %v221_v19 = vsel %vm216_vm0, %v199_v12, 0  ;;  %v314_v21 = vand.u32 4294901760, %v266_v13  ;;  %v317_v22 = vand.u32 4294901760, %v269_v16 }
  0x22   : > { %v1980_v11 = vpack.c.bf16 %v311_v8, %v308_v7  ;;  %v1985_v17 = vsub.f32 %v260_v2, %v308_v7  ;;  %v1987_v18 = vsub.f32 %v263_v3, %v311_v8  ;;  %v375_v23 = vand.u32 4294901760, %v1915_v45 }
  0x23   : > { %v382_v26 = vand.u32 4294901760, %v1917_v46  ;;  %v2000_v27 = vand.u32 4294901760, %v221_v19  ;;  %v2002_v29 = vpack.c.bf16 %v317_v22, %v314_v21  ;;  %v2006_v32 = vsub.f32 %v266_v13, %v314_v21 }
  0x24   : > { %v1994_v20 = vpack.c.bf16 %v1987_v18, %v1985_v17  ;;  %v376_v30 = vsub.f32 %v1915_v45, %v375_v23  ;;  %v2008_v33 = vsub.f32 %v269_v16, %v317_v22  ;;  %v389_v39 = vand.u32 4294901760, %v1919_v47 }
  0x25   : > { %v383_v31 = vsub.f32 %v1917_v46, %v382_v26  ;;  %v2011_v34 = vsub.f32 %v221_v19, %v2000_v27  ;;  %v396_v40 = vand.u32 4294901760, %v1921_v48  ;;  %v1690_v44 = vpack.c.bf16 %v382_v26, %v375_v23 }
  0x26   : > { %v2017_v35 = vpack.c.bf16 %v2008_v33, %v2006_v32  ;;  %v377_v37 = vand.u32 4294901760, %v376_v30  ;;  %v390_v45 = vsub.f32 %v1919_v47, %v389_v39  ;;  %v403_v61 = vand.u32 4294901760, %v1924_v50 }
  0x27   : > { %v384_v38 = vand.u32 4294901760, %v383_v31  ;;  %v364_v41 = vand.u32 4294901760, %v2011_v34  ;;  %v397_v46 = vsub.f32 %v1921_v48, %v396_v40  ;;  %v410_v62 = vand.u32 4294901760, %v1926_v51 }
  0x28   : > { %1573 = vmatpush3.bf16.xpose.msra.mxu1 %v1887_v25  ;;  %1669 = vmatpush3.bf16.xpose.msra.mxu0 %v1887_v25  ;;  %v391_v54 = vand.u32 4294901760, %v390_v45  ;;  %v1694_v7 = vpack.c.bf16 %v396_v40, %v389_v39  ;;  %v404_v47 = vsub.f32 %v1924_v50, %v403_v61  ;;  %v417_v10 = vand.u32 4294901760, %v1938_v55 }
  0x29   : > { %1575 = vmatprep.subr.bf16.mxu1 %v1902_v36  ;;  %1671 = vmatprep.subr.bf16.mxu0 %v1902_v36  ;;  %v1594_v42 = vpack.c.bf16 %v384_v38, %v377_v37  ;;  %v365_v49 = vsub.f32 %v2011_v34, %v364_v41  ;;  %v398_v57 = vand.u32 4294901760, %v397_v46  ;;  %v411_v48 = vsub.f32 %v1926_v51, %v410_v62 }
  0x2a   : > { %v405_v8 = vand.u32 4294901760, %v404_v47  ;;  %v424_v12 = vand.u32 4294901760, %v1940_v56  ;;  %v1698_v50 = vpack.c.bf16 %v410_v62, %v403_v61  ;;  %v418_v51 = vsub.f32 %v1938_v55, %v417_v10 }
  0x2b   : > { %v366_v2 = vand.u32 4294901760, %v365_v49  ;;  %v1598_v3 = vpack.c.bf16 %v398_v57, %v391_v54  ;;  %v412_v9 = vand.u32 4294901760, %v411_v48  ;;  %v431_v22 = vand.u32 4294901760, %v1944_v58 }
  0x2c   : > { %v425_v16 = vsub.f32 %v1940_v56, %v424_v12  ;;  %v419_v19 = vand.u32 4294901760, %v418_v51  ;;  %v438_v23 = vand.u32 4294901760, %v1946_v59  ;;  %v1702_v30 = vpack.c.bf16 %v424_v12, %v417_v10 }
  0x2d   : > { %v1602_v13 = vpack.c.bf16 %v412_v9, %v405_v8  ;;  %v432_v31 = vsub.f32 %v1944_v58, %v431_v22  ;;  %v445_v38 = vand.u32 4294901760, %v1966_v4  ;;  %v452_v39 = vand.u32 4294901760, %v1968_v5 }
  0x2e   : > { %v426_v21 = vand.u32 4294901760, %v425_v16  ;;  %v439_v37 = vsub.f32 %v1946_v59, %v438_v23  ;;  %v459_v45 = vand.u32 4294901760, %v1985_v17  ;;  %v466_v46 = vand.u32 4294901760, %v1987_v18 }
  0x2f   : > { %v433_v55 = vand.u32 4294901760, %v432_v31  ;;  %v1710_v54 = vpack.c.bf16 %v452_v39, %v445_v38  ;;  %v473_v62 = vand.u32 4294901760, %v2006_v32 }
  0x30   : > { %1577 = vmatpush3.bf16.xpose.msra.mxu1 %v1902_v36  ;;  %1673 = vmatpush3.bf16.xpose.msra.mxu0 %v1902_v36  ;;  %v1606_v26 = vpack.c.bf16 %v426_v21, %v419_v19  ;;  %v440_v56 = vand.u32 4294901760, %v439_v37  ;;  %v460_v57 = vsub.f32 %v1985_v17, %v459_v45  ;;  %v467_v61 = vsub.f32 %v1987_v18, %v466_v46 }
  0x31   : > { %1579 = vmatprep.subr.bf16.mxu1 %v1912_v43  ;;  %1675 = vmatprep.subr.bf16.mxu0 %v1912_v43  ;;  %v474_v47 = vsub.f32 %v2006_v32, %v473_v62 }
  0x32   : > { %v1610_v40 = vpack.c.bf16 %v440_v56, %v433_v55 }
  0x33   : > { %v475_v17 = vand.u32 4294901760, %v474_v47 }
  0x38   : > { %1581 = vmatpush3.bf16.xpose.msra.mxu1 %v1912_v43  ;;  %1677 = vmatpush3.bf16.xpose.msra.mxu0 %v1912_v43 }
  0x39   : > { %1583 = vmatprep.subr.bf16.mxu1 %v1962_v1  ;;  %1679 = vmatprep.subr.bf16.mxu0 %v1962_v1 }
  0x40   : > { %1585 = vmatpush3.bf16.xpose.msra.mxu1 %v1962_v1  ;;  %1681 = vmatpush3.bf16.xpose.msra.mxu0 %v1962_v1 }
  0x41   : > { %1587 = vmatprep.subr.bf16.mxu1 %v1980_v11  ;;  %1683 = vmatprep.subr.bf16.mxu0 %v1980_v11 }
  0x48   : > { %1589 = vmatpush3.bf16.xpose.msra.mxu1 %v1980_v11  ;;  %1685 = vmatpush3.bf16.xpose.msra.mxu0 %v1980_v11 }
  0x49   : > { %1591 = vmatprep.subr.bf16.mxu1 %v2002_v29  ;;  %1687 = vmatprep.subr.bf16.mxu0 %v2002_v29 }
  0x50   : > { %1593 = vmatpush3.bf16.xpose.msra.mxu1 %v2002_v29  ;;  %1689 = vmatpush3.bf16.xpose.msra.mxu0 %v2002_v29 }
  0x51   : > { %1595 = vmatprep.subr.bf16.mxu1 %v1594_v42  ;;  %1691 = vmatprep.subr.bf16.mxu0 %v1690_v44 }
  0x57   : > { %1385 = vmatmul.mubr.f32.vlgmr.msra.gmra.mrb[0].mxu1 %v366_v2  ;;  %1490 = vmatmul.mubr.f32.vlgmr.msra.gmra.mrb[0].mxu0 %v364_v41  ;;  %v1706_v41 = vpack.c.bf16 %v438_v23, %v431_v22  ;;  %v480_v2 = vand.u32 4294901760, %v2008_v33 }
  0x58   : > { %1597 = vmatpush3.bf16.xpose.msra.mxu1 %v1594_v42  ;;  %1693 = vmatpush3.bf16.xpose.msra.mxu0 %v1690_v44  ;;  %v446_v42 = vsub.f32 %v1966_v4, %v445_v38  ;;  %v453_v44 = vsub.f32 %v1968_v5, %v452_v39  ;;  %v461_v4 = vand.u32 4294901760, %v460_v57  ;;  %v468_v5 = vand.u32 4294901760, %v467_v61 }
  0x59   : > { %1599 = vmatprep.subr.bf16.mxu1 %v1598_v3  ;;  %1695 = vmatprep.subr.bf16.mxu0 %v1694_v7  ;;  %v481_v48 = vsub.f32 %v2008_v33, %v480_v2  ;;  %v1718_v9 = vpack.c.bf16 %v480_v2, %v473_v62 }
  0x5a   : > { %1419 = vmatprep.mubr.f32.mxu1 %v1885_v24  ;;  %1524 = vmatprep.mubr.f32.mxu0 %v1885_v24  ;;  %v447_v58 = vand.u32 4294901760, %v446_v42  ;;  %v454_v59 = vand.u32 4294901760, %v453_v44 }
  0x5b   : > { %v482_v18 = vand.u32 4294901760, %v481_v48 }
  0x5c   : > { %v1614_v49 = vpack.c.bf16 %v454_v59, %v447_v58 }
  0x5d   : > { %v1622_v8 = vpack.c.bf16 %v482_v18, %v475_v17 }
  0x60   : > { %1601 = vmatpush3.bf16.xpose.msra.mxu1 %v1598_v3  ;;  %1697 = vmatpush3.bf16.xpose.msra.mxu0 %v1694_v7  ;;  %v1618_v3 = vpack.c.bf16 %v468_v5, %v461_v4  ;;  %v1714_v7 = vpack.c.bf16 %v466_v46, %v459_v45 }
  0x61   : > { %1603 = vmatprep.subr.bf16.mxu1 %v1602_v13  ;;  %1699 = vmatprep.subr.bf16.mxu0 %v1698_v50 }
  0x68   : > { %1605 = vmatpush3.bf16.xpose.msra.mxu1 %v1602_v13  ;;  %1701 = vmatpush3.bf16.xpose.msra.mxu0 %v1698_v50 }
  0x69   : > { %1607 = vmatprep.subr.bf16.mxu1 %v1606_v26  ;;  %1703 = vmatprep.subr.bf16.mxu0 %v1702_v30 }
  0x70   : > { %1609 = vmatpush3.bf16.xpose.msra.mxu1 %v1606_v26  ;;  %1705 = vmatpush3.bf16.xpose.msra.mxu0 %v1702_v30 }
  0x71   : > { %1611 = vmatprep.subr.bf16.mxu1 %v1610_v40  ;;  %1707 = vmatprep.subr.bf16.mxu0 %v1706_v41 }
  0x78   : > { %1613 = vmatpush3.bf16.xpose.msra.mxu1 %v1610_v40  ;;  %1709 = vmatpush3.bf16.xpose.msra.mxu0 %v1706_v41 }
  0x79   : > { %1615 = vmatprep.subr.bf16.mxu1 %v1614_v49  ;;  %1711 = vmatprep.subr.bf16.mxu0 %v1710_v54 }
  0x80   : > { %1617 = vmatpush3.bf16.xpose.msra.mxu1 %v1614_v49  ;;  %1713 = vmatpush3.bf16.xpose.msra.mxu0 %v1710_v54 }
  0x81   : > { %1619 = vmatprep.subr.bf16.mxu1 %v1618_v3  ;;  %1715 = vmatprep.subr.bf16.mxu0 %v1714_v7 }
  0x88   : > { %1621 = vmatpush3.bf16.xpose.msra.mxu1 %v1618_v3  ;;  %1717 = vmatpush3.bf16.xpose.msra.mxu0 %v1714_v7 }
  0x89   : > { %1623 = vmatprep.subr.bf16.mxu1 %v1622_v8  ;;  %1719 = vmatprep.subr.bf16.mxu0 %v1718_v9 }
  0x90   : > { %1625 = vmatpush3.bf16.xpose.msra.mxu1 %v1622_v8  ;;  %1721 = vmatpush3.bf16.xpose.msra.mxu0 %v1718_v9 }
  0x91   : > { %1627 = vmatprep.subr.bf16.mxu1 %v1930_v52  ;;  %1723 = vmatprep.subr.bf16.mxu0 %v1864_v14 }
  0x97   : > { %1420 = vmatmul.mubr.f32.vlgmr.msra.gmra.mrb[0].mxu1 %v2000_v27  ;;  %1525 = vmatmul.mubr.f32.vlgmr.msra.gmra.mrb[0].mxu0 %v2000_v27 }
  0x98   : > { %1629 = vmatpush3.bf16.xpose.msra.mxu1 %v1930_v52  ;;  %1725 = vmatpush3.bf16.xpose.msra.mxu0 %v1864_v14 }
  0x99   : > { %1631 = vmatprep.subr.bf16.mxu1 %v1934_v53  ;;  %1727 = vmatprep.subr.bf16.mxu0 %v1871_v15 }
  0x9a   : > { %1454 = vmatprep.mubr.f32.mxu1 %v1892_v28  ;;  %1559 = vmatprep.mubr.f32.mxu0 %v1885_v24 }
  0xa0   : > { %1633 = vmatpush3.bf16.xpose.msra.mxu1 %v1934_v53  ;;  %1729 = vmatpush3.bf16.xpose.msra.mxu0 %v1871_v15  ;;  %v964_v53 = vlaneseq }
  0xa1   : > { %1635 = vmatprep.subr.bf16.mxu1 %v1950_v60  ;;  %1731 = vmatprep.subr.bf16.mxu0 %v1887_v25 }
  0xa8   : > { %1637 = vmatpush3.bf16.xpose.msra.mxu1 %v1950_v60  ;;  %1733 = vmatpush3.bf16.xpose.msra.mxu0 %v1887_v25 }
  0xa9   : > { %1639 = vmatprep.subr.bf16.mxu1 %v1956_v63  ;;  %1735 = vmatprep.subr.bf16.mxu0 %v1902_v36 }
  0xb0   : > { %1641 = vmatpush3.bf16.xpose.msra.mxu1 %v1956_v63  ;;  %1737 = vmatpush3.bf16.xpose.msra.mxu0 %v1902_v36 }
  0xb1   : > { %1643 = vmatprep.subr.bf16.mxu1 %v1960_v0  ;;  %1739 = vmatprep.subr.bf16.mxu0 %v1912_v43 }
  0xb8   : > { %1645 = vmatpush3.bf16.xpose.msra.mxu1 %v1960_v0  ;;  %1741 = vmatpush3.bf16.xpose.msra.mxu0 %v1912_v43  ;;  %v2093_v0 = vshrl.u32 %v964_v53, 7 }
  0xb9   : > { %1647 = vmatprep.subr.bf16.mxu1 %v1974_v6  ;;  %1743 = vmatprep.subr.bf16.mxu0 %v1962_v1 }
  0xc0   : > { %1649 = vmatpush3.bf16.xpose.msra.mxu1 %v1974_v6  ;;  %1745 = vmatpush3.bf16.xpose.msra.mxu0 %v1962_v1 }
  0xc1   : > { %1651 = vmatprep.subr.bf16.mxu1 %v1994_v20  ;;  %1747 = vmatprep.subr.bf16.mxu0 %v1980_v11 }
  0xc8   : > { %1653 = vmatpush3.bf16.xpose.msra.mxu1 %v1994_v20  ;;  %1749 = vmatpush3.bf16.xpose.msra.mxu0 %v1980_v11  ;;  %v2096_v11 = vadd.s32 8, %v2093_v0 }
  0xc9   : > { %1655 = vmatprep.subr.bf16.mxu1 %v2017_v35  ;;  %1751 = vmatprep.subr.bf16.mxu0 %v2002_v29 }
  0xd0   : > { %1657 = vmatpush3.bf16.xpose.msra.mxu1 %v2017_v35  ;;  %1753 = vmatpush3.bf16.xpose.msra.mxu0 %v2002_v29 }
  0xd7   : > { %1455 = vmatmul.mubr.f32.vlgmr.msra.gmra.mrb[0].mxu1 %v2011_v34  ;;  %1560 = vmatmul.mubr.f32.vlgmr.msra.gmra.mrb[0].mxu0 %v2000_v27 }
 0x1aa   : > { %v1456_v14 = vpop.f32.mrb[0].mxu1  ;;  %v1561_v15 = vpop.f32.mrb[0].mxu0 }
 0x1ab   : > { %v1754_v24 = vadd.f32 %v1561_v15, %v1456_v14  ;;  %v629_v25 = vpop.f32.mrb[1].mxu1  ;;  %v945_v28 = vpop.f32.mrb[1].mxu0 }
 0x1ac   : > { %v1755_v36 = vadd.f32 %v945_v28, %v629_v25 }
 0x1ae   : > { %v957_v43 = vmax.f32 %v1755_v36, %v1754_v24 }
 0x1b0   : > { %v958_v52 = vrot.slane %v957_v43, 4 }
 0x1b2   : > { %v959_v60 = vmax.f32 %v957_v43, %v958_v52 }
 0x1b4   : > { %v960_v63 = vrot.slane %v959_v60, 2 }
 0x1b6   : > { %v961_v1 = vmax.f32 %v959_v60, %v960_v63 }
 0x1b8   : > { %v962_v6 = vrot.slane %v961_v1, 1 }
 0x1ba   : > { %v963_v20 = vmax.f32 %v961_v1, %v962_v6 }
 0x1bc   : > { %vm967_vm1 = vcmp.ge.f32.partialorder %v1755_v36, %v963_v20  ;;  %vm968_vm2 = vcmp.ge.f32.partialorder %v1754_v24, %v963_v20 }
 0x1bd   : > { %v969_v27 = vsel %vm967_vm1, %v2093_v0, 16  ;;  %v970_v29 = vsel %vm968_vm2, %v2096_v11, 16 }
 0x1be   : > { %vm971_vm3 = vcmp.lt.s32.totalorder %v969_v27, %v970_v29 }
 0x1bf   : > { %v972_v32 = vsel %vm971_vm3, %v969_v27, %v970_v29 }
 0x1c0   : > { %v973_v33 = vrot.slane %v972_v32, 4 }
 0x1c2   : > { %vm974_vm4 = vcmp.lt.s32.totalorder %v972_v32, %v973_v33 }
 0x1c3   : > { %v975_v34 = vsel %vm974_vm4, %v972_v32, %v973_v33 }
 0x1c4   : > { %v976_v35 = vrot.slane %v975_v34, 2 }
 0x1c6   : > { %vm977_vm5 = vcmp.lt.s32.totalorder %v975_v34, %v976_v35 }
 0x1c7   : > { %v978_v10 = vsel %vm977_vm5, %v975_v34, %v976_v35 }
 0x1c8   : > { %v979_v12 = vrot.slane %v978_v10, 1 }
 0x1ca   : > { %vm980_vm6 = vcmp.lt.s32.totalorder %v978_v10, %v979_v12 }
 0x1cb   : > { %v981_v13 = vsel %vm980_vm6, %v978_v10, %v979_v12 }
 0x1cc   : > { %vm982_vm7 = vcmp.eq.s32.totalorder %v2093_v0, %v981_v13  ;;  %vm983_vm8 = vcmp.eq.s32.totalorder %v2096_v11, %v981_v13 }
 0x1cd   : > { %v986_v50 = vsel %vm982_vm7, -inf, %v1755_v36  ;;  %v987_v51 = vsel %vm983_vm8, -inf, %v1754_v24  ;;  %vm1132_vm7 = vcmask 1041408  }
 0x1ce   : > { %v990_v16 = vmax.f32 %v986_v50, %v987_v51 }
 0x1d0   : > { %v991_v19 = vrot.slane %v990_v16, 4 }
 0x1d2   : > { %v992_v21 = vmax.f32 %v990_v16, %v991_v19 }
 0x1d4   : > { %v993_v22 = vrot.slane %v992_v21, 2 }
 0x1d6   : > { %v994_v23 = vmax.f32 %v992_v21, %v993_v22 }
 0x1d8   : > { %v995_v26 = vrot.slane %v994_v23, 1 }
 0x1da   : > { %v996_v30 = vmax.f32 %v994_v23, %v995_v26 }
 0x1dc   : > { %vm997_vm9 = vcmp.ge.f32.partialorder %v986_v50, %v996_v30  ;;  %vm998_vm10 = vcmp.ge.f32.partialorder %v987_v51, %v996_v30 }
 0x1dd   : > { %v999_v31 = vsel %vm997_vm9, %v2093_v0, 16  ;;  %v1000_v37 = vsel %vm998_vm10, %v2096_v11, 16 }
 0x1de   : > { %vm1001_vm11 = vcmp.lt.s32.totalorder %v999_v31, %v1000_v37 }
 0x1df   : > { %v1002_v55 = vsel %vm1001_vm11, %v999_v31, %v1000_v37 }
 0x1e0   : > { %v1003_v56 = vrot.slane %v1002_v55, 4 }
 0x1e2   : > { %vm1004_vm12 = vcmp.lt.s32.totalorder %v1002_v55, %v1003_v56 }
 0x1e3   : > { %v1005_v38 = vsel %vm1004_vm12, %v1002_v55, %v1003_v56 }
 0x1e4   : > { %v1006_v39 = vrot.slane %v1005_v38, 2 }
 0x1e6   : > { %vm1007_vm13 = vcmp.lt.s32.totalorder %v1005_v38, %v1006_v39 }
 0x1e7   : > { %v1008_v40 = vsel %vm1007_vm13, %v1005_v38, %v1006_v39 }
 0x1e8   : > { %v1009_v41 = vrot.slane %v1008_v40, 1 }
 0x1ea   : > { %vm1010_vm15 = vcmp.lt.s32.totalorder %v1008_v40, %v1009_v41 }
 0x1eb   : > { %v1011_v42 = vsel %vm1010_vm15, %v1008_v40, %v1009_v41 }
 0x1ec   : > { %vm1012_vm0 = vcmp.eq.s32.totalorder %v2093_v0, %v1011_v42  ;;  %vm1013_vm1 = vcmp.eq.s32.totalorder %v2096_v11, %v1011_v42  ;;  %v1131_v44 = vsel %vm1130_vm14, %v981_v13, %v1011_v42 }
 0x1ed   : > { %v1016_v58 = vsel %vm1012_vm0, -inf, %v986_v50  ;;  %v1017_v59 = vsel %vm1013_vm1, -inf, %v987_v51  ;;  %vm1134_vm0 = vcmask 1042432  }
 0x1ee   : > { %v1020_v45 = vmax.f32 %v1016_v58, %v1017_v59 }
 0x1f0   : > { %v1021_v46 = vrot.slane %v1020_v45, 4 }
 0x1f2   : > { %v1022_v49 = vmax.f32 %v1020_v45, %v1021_v46 }
 0x1f4   : > { %v1023_v54 = vrot.slane %v1022_v49, 2 }
 0x1f6   : > { %v1024_v57 = vmax.f32 %v1022_v49, %v1023_v54 }
 0x1f8   : > { %v1025_v61 = vrot.slane %v1024_v57, 1 }
 0x1fa   : > { %v1026_v4 = vmax.f32 %v1024_v57, %v1025_v61 }
 0x1fc   : > { %vm1027_vm2 = vcmp.ge.f32.partialorder %v1016_v58, %v1026_v4  ;;  %vm1028_vm3 = vcmp.ge.f32.partialorder %v1017_v59, %v1026_v4 }
 0x1fd   : > { %v1029_v5 = vsel %vm1027_vm2, %v2093_v0, 16  ;;  %v1030_v62 = vsel %vm1028_vm3, %v2096_v11, 16 }
 0x1fe   : > { %vm1031_vm4 = vcmp.lt.s32.totalorder %v1029_v5, %v1030_v62 }
 0x1ff   : > { %v1032_v2 = vsel %vm1031_vm4, %v1029_v5, %v1030_v62 }
 0x200   : > { %v1033_v3 = vrot.slane %v1032_v2, 4 }
 0x202   : > { %vm1034_vm5 = vcmp.lt.s32.totalorder %v1032_v2, %v1033_v3 }
 0x203   : > { %v1035_v7 = vsel %vm1034_vm5, %v1032_v2, %v1033_v3 }
 0x204   : > { %v1036_v47 = vrot.slane %v1035_v7, 2 }
 0x206   : > { %vm1037_vm6 = vcmp.lt.s32.totalorder %v1035_v7, %v1036_v47 }
 0x207   : > { %v1038_v48 = vsel %vm1037_vm6, %v1035_v7, %v1036_v47 }
 0x208   : > { %v1039_v17 = vrot.slane %v1038_v48, 1 }
 0x20a   : > { %vm1040_vm8 = vcmp.lt.s32.totalorder %v1038_v48, %v1039_v17 }
 0x20b   : > { %v1041_v18 = vsel %vm1040_vm8, %v1038_v48, %v1039_v17 }
 0x20c   : > { %vm1042_vm9 = vcmp.eq.s32.totalorder %v2093_v0, %v1041_v18  ;;  %vm1043_vm10 = vcmp.eq.s32.totalorder %v2096_v11, %v1041_v18  ;;  %v1133_v8 = vsel %vm1132_vm7, %v1131_v44, %v1041_v18 }
 0x20d   : > { %v1046_v9 = vsel %vm1042_vm9, -inf, %v1016_v58  ;;  %v1047_v14 = vsel %vm1043_vm10, -inf, %v1017_v59  ;;  %vm1136_vm9 = vcmask 1043456  }
 0x20e   : > { %v1050_v15 = vmax.f32 %v1046_v9, %v1047_v14 }
 0x210   : > { %v1051_v24 = vrot.slane %v1050_v15, 4 }
 0x212   : > { %v1052_v25 = vmax.f32 %v1050_v15, %v1051_v24 }
 0x214   : > { %v1053_v28 = vrot.slane %v1052_v25, 2 }
 0x216   : > { %v1054_v36 = vmax.f32 %v1052_v25, %v1053_v28 }
 0x218   : > { %v1055_v43 = vrot.slane %v1054_v36, 1 }
 0x21a   : > { %v1056_v52 = vmax.f32 %v1054_v36, %v1055_v43 }
 0x21c   : > { %vm1057_vm11 = vcmp.ge.f32.partialorder %v1046_v9, %v1056_v52  ;;  %vm1058_vm12 = vcmp.ge.f32.partialorder %v1047_v14, %v1056_v52 }
 0x21d   : > { %v1059_v53 = vsel %vm1057_vm11, %v2093_v0, 16  ;;  %v1060_v60 = vsel %vm1058_vm12, %v2096_v11, 16 }
 0x21e   : > { %vm1061_vm13 = vcmp.lt.s32.totalorder %v1059_v53, %v1060_v60 }
 0x21f   : > { %v1062_v63 = vsel %vm1061_vm13, %v1059_v53, %v1060_v60 }
 0x220   : > { %v1063_v1 = vrot.slane %v1062_v63, 4 }
 0x222   : > { %vm1064_vm14 = vcmp.lt.s32.totalorder %v1062_v63, %v1063_v1 }
 0x223   : > { %v1065_v6 = vsel %vm1064_vm14, %v1062_v63, %v1063_v1 }
 0x224   : > { %v1066_v20 = vrot.slane %v1065_v6, 2 }
 0x226   : > { %vm1067_vm15 = vcmp.lt.s32.totalorder %v1065_v6, %v1066_v20 }
 0x227   : > { %v1068_v27 = vsel %vm1067_vm15, %v1065_v6, %v1066_v20 }
 0x228   : > { %v1069_v29 = vrot.slane %v1068_v27, 1 }
 0x22a   : > { %vm1070_vm1 = vcmp.lt.s32.totalorder %v1068_v27, %v1069_v29 }
 0x22b   : > { %v1071_v32 = vsel %vm1070_vm1, %v1068_v27, %v1069_v29 }
 0x22c   : > { %vm1072_vm2 = vcmp.eq.s32.totalorder %v2093_v0, %v1071_v32  ;;  %vm1073_vm3 = vcmp.eq.s32.totalorder %v2096_v11, %v1071_v32  ;;  %v1135_v33 = vsel %vm1134_vm0, %v1133_v8, %v1071_v32 }
 0x22d   : > { %v1076_v34 = vsel %vm1072_vm2, -inf, %v1046_v9  ;;  %v1077_v35 = vsel %vm1073_vm3, -inf, %v1047_v14  ;;  %vm1138_vm2 = vcmask 1044480  }
 0x22e   : > { %v1080_v10 = vmax.f32 %v1076_v34, %v1077_v35 }
 0x230   : > { %v1081_v12 = vrot.slane %v1080_v10, 4 }
 0x232   : > { %v1082_v13 = vmax.f32 %v1080_v10, %v1081_v12 }
 0x234   : > { %v1083_v50 = vrot.slane %v1082_v13, 2 }
 0x236   : > { %v1084_v51 = vmax.f32 %v1082_v13, %v1083_v50 }
 0x238   : > { %v1085_v16 = vrot.slane %v1084_v51, 1 }
 0x23a   : > { %v1086_v19 = vmax.f32 %v1084_v51, %v1085_v16 }
 0x23c   : > { %vm1087_vm4 = vcmp.ge.f32.partialorder %v1076_v34, %v1086_v19  ;;  %vm1088_vm5 = vcmp.ge.f32.partialorder %v1077_v35, %v1086_v19 }
 0x23d   : > { %v1089_v21 = vsel %vm1087_vm4, %v2093_v0, 16  ;;  %v1090_v22 = vsel %vm1088_vm5, %v2096_v11, 16 }
 0x23e   : > { %vm1091_vm6 = vcmp.lt.s32.totalorder %v1089_v21, %v1090_v22 }
 0x23f   : > { %v1092_v23 = vsel %vm1091_vm6, %v1089_v21, %v1090_v22 }
 0x240   : > { %v1093_v26 = vrot.slane %v1092_v23, 4 }
 0x242   : > { %vm1094_vm7 = vcmp.lt.s32.totalorder %v1092_v23, %v1093_v26 }
 0x243   : > { %v1095_v30 = vsel %vm1094_vm7, %v1092_v23, %v1093_v26 }
 0x244   : > { %v1096_v31 = vrot.slane %v1095_v30, 2 }
 0x246   : > { %vm1097_vm8 = vcmp.lt.s32.totalorder %v1095_v30, %v1096_v31 }
 0x247   : > { %v1098_v37 = vsel %vm1097_vm8, %v1095_v30, %v1096_v31 }
 0x248   : > { %v1099_v55 = vrot.slane %v1098_v37, 1 }
 0x24a   : > { %vm1100_vm10 = vcmp.lt.s32.totalorder %v1098_v37, %v1099_v55 }
 0x24b   : > { %v1101_v56 = vsel %vm1100_vm10, %v1098_v37, %v1099_v55 }
 0x24c   : > { %vm1102_vm11 = vcmp.eq.s32.totalorder %v2093_v0, %v1101_v56  ;;  %vm1103_vm12 = vcmp.eq.s32.totalorder %v2096_v11, %v1101_v56  ;;  %v1137_v38 = vsel %vm1136_vm9, %v1135_v33, %v1101_v56 }
 0x24d   : > { %v1106_v39 = vsel %vm1102_vm11, -inf, %v1076_v34  ;;  %v1107_v40 = vsel %vm1103_vm12, -inf, %v1077_v35 }
 0x24e   : > { %v1108_v41 = vmax.f32 %v1106_v39, %v1107_v40 }
 0x250   : > { %v1109_v42 = vrot.slane %v1108_v41, 4 }
 0x252   : > { %v1110_v44 = vmax.f32 %v1108_v41, %v1109_v42 }
 0x254   : > { %v1111_v58 = vrot.slane %v1110_v44, 2 }
 0x256   : > { %v1112_v59 = vmax.f32 %v1110_v44, %v1111_v58 }
 0x258   : > { %v1113_v45 = vrot.slane %v1112_v59, 1 }
 0x25a   : > { %v1114_v46 = vmax.f32 %v1112_v59, %v1113_v45 }
 0x25c   : > { %vm1115_vm13 = vcmp.ge.f32.partialorder %v1106_v39, %v1114_v46  ;;  %vm1116_vm14 = vcmp.ge.f32.partialorder %v1107_v40, %v1114_v46 }
 0x25d   : > { %v1117_v49 = vsel %vm1115_vm13, %v2093_v0, 16  ;;  %v1118_v54 = vsel %vm1116_vm14, %v2096_v11, 16 }
 0x25e   : > { %vm1119_vm15 = vcmp.lt.s32.totalorder %v1117_v49, %v1118_v54 }
 0x25f   : > { %v1120_v57 = vsel %vm1119_vm15, %v1117_v49, %v1118_v54 }
 0x260   : > { %v1121_v61 = vrot.slane %v1120_v57, 4 }
 0x262   : > { %vm1122_vm0 = vcmp.lt.s32.totalorder %v1120_v57, %v1121_v61 }
 0x263   : > { %v1123_v4 = vsel %vm1122_vm0, %v1120_v57, %v1121_v61 }
 0x264   : > { %v1124_v5 = vrot.slane %v1123_v4, 2 }
 0x266   : > { %vm1125_vm1 = vcmp.lt.s32.totalorder %v1123_v4, %v1124_v5 }
 0x267   : > { %v1126_v62 = vsel %vm1125_vm1, %v1123_v4, %v1124_v5 }
 0x268   : > { %v1127_v2 = vrot.slane %v1126_v62, 1 }
 0x26a   : > { %vm1128_vm3 = vcmp.lt.s32.totalorder %v1126_v62, %v1127_v2 }
 0x26b   : > { %v1129_v3 = vsel %vm1128_vm3, %v1126_v62, %v1127_v2 }
 0x26c   : > { %v1139_v0 = vsel %vm1138_vm2, %v1137_v38, %v1129_v3 }
 0x26d   : > { %1140 = vst [vmem:[%s197_s24] sm:$0x3f] %v1139_v0 }
 0x26e PF: > { %s12_s11 = sadd.s32 1, %s1810_s11   ;;  %s2136_s9 = smov %s1806_s10 }
 0x26f   : > { %p9_p5 = scmp.ge.s32.totalorder %s12_s11, 4   ;;  %s2137_s10 = smov %s2139_s12 }
 0x271   :  { %11 = sbr.rel (!%p9_p5) target bundleno = 2 (0x2), region = 61 }

</bundles_post_ra>
